<compile_context>
chip_gen: v7x
topology: tpu7x:2x2x1
jax: 0.10.0
libtpu: 0.0.40
codegen_flags: <defaults>
</compile_context>

<pallas_src>
import functools
import math

import jax
import jax.numpy as jnp
from jax.experimental import pallas as pl
from jax.experimental.pallas import tpu as pltpu


# ----------------------------------------------------------------------------
# helpers
# ----------------------------------------------------------------------------
def _round_up(x, m):
    return ((x + m - 1) // m) * m


def _pick_col_tile(out_p, max_tile=512):
    """Largest multiple-of-128 tile <= max_tile dividing the padded out dim."""
    if out_p <= max_tile:
        return out_p
    for t in range(max_tile, 0, -128):
        if out_p % t == 0:
            return t
    return 128  # unreachable: out_p is always a multiple of 128


def _apply_act(x, activation):
    if activation == "relu":
        return jnp.maximum(x, 0.0)
    if activation == "tanh":
        return jnp.tanh(x)
    if activation == "sigmoid":
        return jax.nn.sigmoid(x)
    if activation in ("none", "identity", "linear"):
        return x
    raise ValueError(f"unknown activation: {activation}")


# ----------------------------------------------------------------------------
# Fused multi-layer MLP kernel (entire encoder+decoder in one kernel)
# ----------------------------------------------------------------------------
def _fused_mlp_kernel(*args, num_layers, activations, emit_idx):
    """args = [x_ref, w0, b0, ..., w_{L-1}, b_{L-1}, (z_ref?), y_ref, h_scratch].

    Grid = (row_tiles, out_col_tiles).  Layers 0..L-2 are computed once per
    batch row tile (j == 0) and kept resident in VMEM; only the last (largest)
    layer is re-run per output column tile j, streaming its weight columns.
    """
    x_ref = args[0]
    w_refs = [args[1 + 2 * l] for l in range(num_layers)]
    b_refs = [args[2 + 2 * l] for l in range(num_layers)]
    pos = 1 + 2 * num_layers
    z_ref = None
    if emit_idx is not None:
        z_ref = args[pos]
        pos += 1
    y_ref = args[pos]
    h_scratch = args[pos + 1]

    j = pl.program_id(1)

    @pl.when(j == 0)
    def _():
        h = x_ref[...]
        for l in range(num_layers - 1):
            acc = jnp.dot(h, w_refs[l][...],
                          preferred_element_type=jnp.float32) + b_refs[l][...]
            acc = _apply_act(acc, activations[l])          # f32 VPU/EUP math
            if emit_idx is not None and l == emit_idx:
                z_ref[...] = acc.astype(z_ref.dtype)
            h = acc.astype(w_refs[l + 1].dtype)            # bf16 for next MXU pass
        h_scratch[...] = h

    y = jnp.dot(h_scratch[...], w_refs[-1][...],
                preferred_element_type=jnp.float32) + b_refs[-1][...]
    y_ref[...] = _apply_act(y, activations[-1]).astype(y_ref.dtype)


def fused_mlp_forward(x2d, layers, activations, *, emit_idx=None,
                      emit_true_dim=None, out_true_dim=None,
                      weight_dtype=jnp.bfloat16):
    """Run an entire dense stack (all layers fused) in ONE pallas_call.

    x2d:    (B, d_in) float32 (unpadded).
    layers: [(w_p, b_p), ...] with w_p (Kp, Np) in `weight_dtype`, b_p (1, Np)
            float32; consecutive padded dims chain (Np of layer l == Kp of l+1).
    Returns (y, z): y = output of the last layer, z = post-activation output of
    layer `emit_idx` (or None), both sliced back to their true (unpadded) dims.
    """
    num_layers = len(layers)
    assert num_layers >= 2
    assert emit_idx is None or emit_idx < num_layers - 1
    assert len(activations) == num_layers

    B, d_in = x2d.shape
    d0_p = int(layers[0][0].shape[0])
    out_p = int(layers[-1][0].shape[1])
    h_last_p = int(layers[-1][0].shape[0])
    out_true = out_p if out_true_dim is None else out_true_dim

    # Row tile: >= 8 sublanes; caps at 128 so a large batch yields a multi-step
    # "parallel" grid axis (megacore sharding on v7x).
    tm = min(128, _round_up(max(B, 1), 8))
    B_pad = _round_up(B, tm)
    # Output-column tile of the last layer (largest weight streams through VMEM).
    tn = _pick_col_tile(out_p)
    grid = (B_pad // tm, out_p // tn)

    # Pad + cast the input once: rows -> B_pad, features -> d0_p (zero padding).
    x_pad = jnp.zeros((B_pad, d0_p), weight_dtype)
    x_pad = x_pad.at[:B, :d_in].set(x2d.astype(weight_dtype))

    in_specs = [pl.BlockSpec((tm, d0_p), lambda i, j: (i, 0))]
    flat_params = []
    for l, (w, b) in enumerate(layers):
        kp, np_ = int(w.shape[0]), int(w.shape[1])
        if l == num_layers - 1:
            in_specs.append(pl.BlockSpec((kp, tn), lambda i, j: (0, j)))
            in_specs.append(pl.BlockSpec((1, tn), lambda i, j: (0, j)))
        else:
            in_specs.append(pl.BlockSpec((kp, np_), lambda i, j: (0, 0)))
            in_specs.append(pl.BlockSpec((1, np_), lambda i, j: (0, 0)))
        flat_params.extend((w, b))

    out_shape = []
    out_specs = []
    if emit_idx is not None:
        emit_p = int(layers[emit_idx][0].shape[1])
        out_shape.append(jax.ShapeDtypeStruct((B_pad, emit_p), jnp.float32))
        out_specs.append(pl.BlockSpec((tm, emit_p), lambda i, j: (i, 0)))
    out_shape.append(jax.ShapeDtypeStruct((B_pad, out_p), jnp.float32))
    out_specs.append(pl.BlockSpec((tm, tn), lambda i, j: (i, j)))

    scratch_shapes = [pltpu.VMEM((tm, h_last_p), weight_dtype)]

    # --- scheduling / memory hints -------------------------------------------
    wbytes = jnp.zeros((), weight_dtype).dtype.itemsize
    flops = 0
    transcendentals = 0
    bytes_accessed = int(x_pad.size) * wbytes
    for l, (w, b) in enumerate(layers):
        flops += 2 * B_pad * int(w.shape[0]) * int(w.shape[1])
        bytes_accessed += int(w.size) * wbytes + int(b.size) * 4
        if activations[l] in ("sigmoid", "tanh"):
            transcendentals += B_pad * int(w.shape[1])
    for s in out_shape:
        bytes_accessed += int(s.shape[0]) * int(s.shape[1]) * 4

    vmem_need = 2 * tm * d0_p * wbytes                       # input (dbl-buffered)
    for l, (w, _) in enumerate(layers):
        ncols = tn if l == num_layers - 1 else int(w.shape[1])
        vmem_need += 2 * (int(w.shape[0]) * ncols * wbytes + ncols * 4)
    if emit_idx is not None:
        vmem_need += 2 * tm * int(layers[emit_idx][0].shape[1]) * 4
    vmem_need += 2 * tm * tn * 4                             # final output block
    vmem_need += tm * h_last_p * wbytes                      # scratch
    vmem_limit = int(min(max(2 * vmem_need + (4 << 20), 16 << 20), 64 << 20))

    kernel = functools.partial(_fused_mlp_kernel, num_layers=num_layers,
                               activations=tuple(activations),
                               emit_idx=emit_idx)
    outs = pl.pallas_call(
        kernel,
        out_shape=tuple(out_shape),
        grid_spec=pltpu.PrefetchScalarGridSpec(
            num_scalar_prefetch=0,
            grid=grid,
            in_specs=in_specs,
            out_specs=tuple(out_specs),
            scratch_shapes=scratch_shapes,
        ),
        compiler_params=pltpu.CompilerParams(
            dimension_semantics=("parallel", "arbitrary"),
            vmem_limit_bytes=vmem_limit,
        ),
        cost_estimate=pl.CostEstimate(flops=flops,
                                      transcendentals=transcendentals,
                                      bytes_accessed=bytes_accessed),
    )(x_pad, *flat_params)

    if emit_idx is not None:
        z_pad, y_pad = outs
        emit_true = (emit_true_dim if emit_true_dim is not None
                     else int(z_pad.shape[1]))
        return y_pad[:B, :out_true], z_pad[:B, :emit_true]
    (y_pad,) = outs
    return y_pad[:B, :out_true], None


# ----------------------------------------------------------------------------
# AE model (concrete MLP autoencoder)
# ----------------------------------------------------------------------------
class AE:
    """Concrete fully-connected realization of the abstract torch `AE`."""

    def __init__(self, en_params, de_params, channels, seq_len, im_size,
                 latent_dim, activation="relu", key=None,
                 weight_dtype=jnp.bfloat16):
        self.en_params = en_params
        self.de_params = de_params
        self.latent_dim = latent_dim
        self.activation = activation          # dispatched inside the kernel
        self.channels = channels
        self.seq_len = seq_len
        self.im_size = im_size
        self.weight_dtype = weight_dtype
        if key is None:                       # FIX: `key or PRNGKey(0)` is invalid on jax arrays
            key = jax.random.PRNGKey(0)
        self._build_network(im_size=im_size, channels=channels,
                            seq_len=seq_len, key=key)

    # -- parameter construction ------------------------------------------------
    def _build_network(self, im_size, channels, seq_len, key):
        self.in_dim = seq_len * channels * im_size * im_size
        k_en, k_de = jax.random.split(key)
        self._build_encoder(k_en)
        self._build_decoder(k_de)

    def _linear_init(self, key, fan_in, fan_out):
        kw, kb = jax.random.split(key)
        bound = 1.0 / math.sqrt(float(fan_in))
        w = jax.random.uniform(kw, (fan_in, fan_out), jnp.float32, -bound, bound)
        b = jax.random.uniform(kb, (fan_out,), jnp.float32, -bound, bound)
        return w, b

    def _pad_layer(self, w, b):
        # Zero-pad both dims to multiples of 128 (lane/MXU friendly) and store
        # the weight in bf16 (bandwidth-bound layers); bias stays f32.
        kp = _round_up(int(w.shape[0]), 128)
        np_ = _round_up(int(w.shape[1]), 128)
        w_p = jnp.zeros((kp, np_), self.weight_dtype)
        w_p = w_p.at[: w.shape[0], : w.shape[1]].set(w.astype(self.weight_dtype))
        b_p = jnp.zeros((1, np_), jnp.float32)
        b_p = b_p.at[0, : b.shape[0]].set(b.astype(jnp.float32))
        return (w_p, b_p)

    def _build_encoder(self, key):
        hidden = self.en_params["hidden_dim"]
        k1, k2 = jax.random.split(key)
        self.enc_layers = [
            self._pad_layer(*self._linear_init(k1, self.in_dim, hidden)),
            self._pad_layer(*self._linear_init(k2, hidden, self.latent_dim)),
        ]

    def _build_decoder(self, key):
        hidden = self.de_params["hidden_dim"]
        k1, k2 = jax.random.split(key)
        self.dec_layers = [
            self._pad_layer(*self._linear_init(k1, self.latent_dim, hidden)),
            self._pad_layer(*self._linear_init(k2, hidden, self.in_dim)),
        ]

    # -- forward pass (Pallas hot path) -----------------------------------------
    def encode(self, x):
        B = x.shape[0]
        x2d = x.reshape(B, self.in_dim)
        z, _ = fused_mlp_forward(
            x2d, self.enc_layers, (self.activation, self.activation),
            out_true_dim=self.latent_dim, weight_dtype=self.weight_dtype)
        return z

    def decode(self, z):
        B = z.shape[0]
        x_hat2d, _ = fused_mlp_forward(
            z, self.dec_layers, (self.activation, "sigmoid"),
            out_true_dim=self.in_dim, weight_dtype=self.weight_dtype)
        return x_hat2d.reshape(B, self.seq_len, self.channels,
                               self.im_size, self.im_size)

    def forward(self, x):
        # Single fused kernel for the entire forward pass: encoder + decoder,
        # all intermediate activations resident in VMEM.
        B = x.shape[0]
        x2d = x.reshape(B, self.in_dim)
        layers = self.enc_layers + self.dec_layers
        acts = (self.activation, self.activation, self.activation, "sigmoid")
        x_hat2d, z = fused_mlp_forward(
            x2d, layers, acts, emit_idx=1, emit_true_dim=self.latent_dim,
            out_true_dim=self.in_dim, weight_dtype=self.weight_dtype)
        x_hat = x_hat2d.reshape(B, self.seq_len, self.channels,
                                self.im_size, self.im_size)
        return x_hat, z

    def __call__(self, x):
        return self.forward(x)


if __name__ == "__main__":
    # Small deterministic example
    batch = 2
    channels = 1
    seq_len = 2
    im_size = 16
    latent_dim = 32
    en_params = {"hidden_dim": 64}
    de_params = {"hidden_dim": 64}

    key = jax.random.PRNGKey(0)
    k_model, k_data = jax.random.split(key)

    model = AE(en_params, de_params, channels=channels, seq_len=seq_len,
               im_size=im_size, latent_dim=latent_dim, activation="relu",
               key=k_model)

    x = jax.random.uniform(k_data,
                           (batch, seq_len, channels, im_size, im_size),
                           jnp.float32)

    # Fully fused forward (one pallas_call covering all 4 layers).
    x_hat, z = model(x)
    jax.block_until_ready(x_hat)
    jax.block_until_ready(z)

    # Standalone encode/decode kernels must agree with the fused path.
    z2 = model.encode(x)
    x_hat2 = model.decode(z2)
    jax.block_until_ready(x_hat2)
    jax.block_until_ready(z2)

    assert x_hat.shape == (batch, seq_len, channels, im_size, im_size)
    assert z.shape == (batch, latent_dim)
    assert bool(jnp.all(jnp.isfinite(x_hat))) and bool(jnp.all(jnp.isfinite(z)))
    assert bool(jnp.allclose(z, z2, atol=1e-3, rtol=1e-3))
    assert bool(jnp.allclose(x_hat, x_hat2, atol=1e-3, rtol=1e-3))

    print("KERNEL_OK")
</pallas_src>

<mosaic_0001>
module attributes {stable_mosaic.version = 11 : i64} {
  func.func @_fused_mlp_kernel(%arg0: i32, %arg1: i32, %arg2: memref<8x512xbf16, #tpu.memory_space<vmem>>, %arg3: memref<512x128xbf16, #tpu.memory_space<vmem>>, %arg4: memref<1x128xf32, #tpu.memory_space<vmem>>, %arg5: memref<128x128xbf16, #tpu.memory_space<vmem>>, %arg6: memref<1x128xf32, #tpu.memory_space<vmem>>, %arg7: memref<128x128xbf16, #tpu.memory_space<vmem>>, %arg8: memref<1x128xf32, #tpu.memory_space<vmem>>, %arg9: memref<128x512xbf16, #tpu.memory_space<vmem>>, %arg10: memref<1x512xf32, #tpu.memory_space<vmem>>, %arg11: memref<8x128xf32, #tpu.memory_space<vmem>>, %arg12: memref<8x512xf32, #tpu.memory_space<vmem>>, %arg13: memref<8x128xbf16, #tpu.memory_space<vmem>>) attributes {dimension_semantics = [#tpu.dimension_semantics<parallel>, #tpu.dimension_semantics<arbitrary>], iteration_bounds = array<i64: 1, 1>, scalar_prefetch = 0 : i64, scratch_operands = 1 : i64, tpu.core_type = #tpu.core_type<tc>, window_params = [{transform_indices = @transform_0, window_bounds = array<i64: 8, 512>}, {pipeline_mode = #tpu.pipeline_mode<synchronous>, transform_indices = @transform_1, window_bounds = array<i64: 512, 128>}, {pipeline_mode = #tpu.pipeline_mode<synchronous>, transform_indices = @transform_2, window_bounds = array<i64: 1, 128>}, {pipeline_mode = #tpu.pipeline_mode<synchronous>, transform_indices = @transform_3, window_bounds = array<i64: 128, 128>}, {pipeline_mode = #tpu.pipeline_mode<synchronous>, transform_indices = @transform_4, window_bounds = array<i64: 1, 128>}, {pipeline_mode = #tpu.pipeline_mode<synchronous>, transform_indices = @transform_5, window_bounds = array<i64: 128, 128>}, {pipeline_mode = #tpu.pipeline_mode<synchronous>, transform_indices = @transform_6, window_bounds = array<i64: 1, 128>}, {transform_indices = @transform_7, window_bounds = array<i64: 128, 512>}, {transform_indices = @transform_8, window_bounds = array<i64: 1, 512>}, {transform_indices = @transform_9, window_bounds = array<i64: 8, 128>}, {transform_indices = @transform_10, window_bounds = array<i64: 8, 512>}]} {
    %c0_i32 = arith.constant 0 : i32
    %0 = arith.cmpi eq, %arg1, %c0_i32 : i32
    %1 = arith.extui %0 : i1 to i32
    %c0_i32_0 = arith.constant 0 : i32
    %2 = arith.cmpi ne, %1, %c0_i32_0 : i32
    scf.if %2 {
      %c0_9 = arith.constant 0 : index
      %c0_10 = arith.constant 0 : index
      %15 = vector.load %arg2[%c0_9, %c0_10] : memref<8x512xbf16, #tpu.memory_space<vmem>>, vector<8x512xbf16>
      %c0_11 = arith.constant 0 : index
      %c0_12 = arith.constant 0 : index
      %16 = vector.load %arg3[%c0_11, %c0_12] : memref<512x128xbf16, #tpu.memory_space<vmem>>, vector<512x128xbf16>
      %cst_13 = arith.constant dense<0.000000e+00> : vector<8x128xf32>
      %17 = tpu.matmul %15, %16, %cst_13 {dimension_numbers = #tpu.dot_dimension_numbers<[1], [0], [0], [1], [0, 0, 1, 1], [], []>} : vector<8x512xbf16>, vector<512x128xbf16>, vector<8x128xf32> -> vector<8x128xf32>
      %c0_14 = arith.constant 0 : index
      %c0_15 = arith.constant 0 : index
      %18 = vector.load %arg4[%c0_14, %c0_15] : memref<1x128xf32, #tpu.memory_space<vmem>>, vector<1x128xf32>
      %19 = vector.broadcast %18 : vector<1x128xf32> to vector<8x128xf32>
      %20 = arith.addf %17, %19 : vector<8x128xf32>
      %cst_16 = arith.constant 0.000000e+00 : f32
      %21 = vector.broadcast %cst_16 : f32 to vector<8x128xf32>
      %22 = arith.maximumf %20, %21 : vector<8x128xf32>
      %23 = arith.truncf %22 : vector<8x128xf32> to vector<8x128xbf16>
      %c0_17 = arith.constant 0 : index
      %c0_18 = arith.constant 0 : index
      %24 = vector.load %arg5[%c0_17, %c0_18] : memref<128x128xbf16, #tpu.memory_space<vmem>>, vector<128x128xbf16>
      %cst_19 = arith.constant dense<0.000000e+00> : vector<8x128xf32>
      %25 = tpu.matmul %23, %24, %cst_19 {dimension_numbers = #tpu.dot_dimension_numbers<[1], [0], [0], [1], [0, 0, 1, 1], [], []>} : vector<8x128xbf16>, vector<128x128xbf16>, vector<8x128xf32> -> vector<8x128xf32>
      %c0_20 = arith.constant 0 : index
      %c0_21 = arith.constant 0 : index
      %26 = vector.load %arg6[%c0_20, %c0_21] : memref<1x128xf32, #tpu.memory_space<vmem>>, vector<1x128xf32>
      %27 = vector.broadcast %26 : vector<1x128xf32> to vector<8x128xf32>
      %28 = arith.addf %25, %27 : vector<8x128xf32>
      %cst_22 = arith.constant 0.000000e+00 : f32
      %29 = vector.broadcast %cst_22 : f32 to vector<8x128xf32>
      %30 = arith.maximumf %28, %29 : vector<8x128xf32>
      %c0_23 = arith.constant 0 : index
      %c0_24 = arith.constant 0 : index
      %31 = vector.load %arg11[%c0_23, %c0_24] : memref<8x128xf32, #tpu.memory_space<vmem>>, vector<8x128xf32>
      tpu.vector_store %arg11[%c0_23, %c0_24], %30 {strides = array<i32>} : memref<8x128xf32, #tpu.memory_space<vmem>>, vector<8x128xf32>,
      %32 = arith.truncf %30 : vector<8x128xf32> to vector<8x128xbf16>
      %c0_25 = arith.constant 0 : index
      %c0_26 = arith.constant 0 : index
      %33 = vector.load %arg7[%c0_25, %c0_26] : memref<128x128xbf16, #tpu.memory_space<vmem>>, vector<128x128xbf16>
      %cst_27 = arith.constant dense<0.000000e+00> : vector<8x128xf32>
      %34 = tpu.matmul %32, %33, %cst_27 {dimension_numbers = #tpu.dot_dimension_numbers<[1], [0], [0], [1], [0, 0, 1, 1], [], []>} : vector<8x128xbf16>, vector<128x128xbf16>, vector<8x128xf32> -> vector<8x128xf32>
      %c0_28 = arith.constant 0 : index
      %c0_29 = arith.constant 0 : index
      %35 = vector.load %arg8[%c0_28, %c0_29] : memref<1x128xf32, #tpu.memory_space<vmem>>, vector<1x128xf32>
      %36 = vector.broadcast %35 : vector<1x128xf32> to vector<8x128xf32>
      %37 = arith.addf %34, %36 : vector<8x128xf32>
      %cst_30 = arith.constant 0.000000e+00 : f32
      %38 = vector.broadcast %cst_30 : f32 to vector<8x128xf32>
      %39 = arith.maximumf %37, %38 : vector<8x128xf32>
      %40 = arith.truncf %39 : vector<8x128xf32> to vector<8x128xbf16>
      %c0_31 = arith.constant 0 : index
      %c0_32 = arith.constant 0 : index
      %41 = vector.load %arg13[%c0_31, %c0_32] : memref<8x128xbf16, #tpu.memory_space<vmem>>, vector<8x128xbf16>
      tpu.vector_store %arg13[%c0_31, %c0_32], %40 {strides = array<i32>} : memref<8x128xbf16, #tpu.memory_space<vmem>>, vector<8x128xbf16>,
    } else {
    }
    %c0 = arith.constant 0 : index
    %c0_1 = arith.constant 0 : index
    %3 = vector.load %arg13[%c0, %c0_1] : memref<8x128xbf16, #tpu.memory_space<vmem>>, vector<8x128xbf16>
    %c0_2 = arith.constant 0 : index
    %c0_3 = arith.constant 0 : index
    %4 = vector.load %arg9[%c0_2, %c0_3] : memref<128x512xbf16, #tpu.memory_space<vmem>>, vector<128x512xbf16>
    %cst = arith.constant dense<0.000000e+00> : vector<8x512xf32>
    %5 = tpu.matmul %3, %4, %cst {dimension_numbers = #tpu.dot_dimension_numbers<[1], [0], [0], [1], [0, 0, 1, 1], [], []>} : vector<8x128xbf16>, vector<128x512xbf16>, vector<8x512xf32> -> vector<8x512xf32>
    %c0_4 = arith.constant 0 : index
    %c0_5 = arith.constant 0 : index
    %6 = vector.load %arg10[%c0_4, %c0_5] : memref<1x512xf32, #tpu.memory_space<vmem>>, vector<1x512xf32>
    %7 = vector.broadcast %6 : vector<1x512xf32> to vector<8x512xf32>
    %8 = arith.addf %5, %7 : vector<8x512xf32>
    %9 = arith.negf %8 : vector<8x512xf32>
    %10 = math.exp %9 : vector<8x512xf32>
    %cst_6 = arith.constant 1.000000e+00 : f32
    %11 = vector.broadcast %cst_6 : f32 to vector<8x512xf32>
    %12 = arith.addf %11, %10 : vector<8x512xf32>
    %13 = arith.divf %11, %12 : vector<8x512xf32>
    %c0_7 = arith.constant 0 : index
    %c0_8 = arith.constant 0 : index
    %14 = vector.load %arg12[%c0_7, %c0_8] : memref<8x512xf32, #tpu.memory_space<vmem>>, vector<8x512xf32>
    tpu.vector_store %arg12[%c0_7, %c0_8], %13 {strides = array<i32>} : memref<8x512xf32, #tpu.memory_space<vmem>>, vector<8x512xf32>,
    return
  }
  func.func @transform_0(%arg0: i32, %arg1: i32) -> (i32, i32) {
    %c0_i32 = arith.constant 0 : i32
    %c0_i32_0 = arith.constant 0 : i32
    return %arg0, %c0_i32 : i32, i32
  }
  func.func @transform_1(%arg0: i32, %arg1: i32) -> (i32, i32) {
    %c0_i32 = arith.constant 0 : i32
    %c0_i32_0 = arith.constant 0 : i32
    %c0_i32_1 = arith.constant 0 : i32
    return %c0_i32, %c0_i32_0 : i32, i32
  }
  func.func @transform_2(%arg0: i32, %arg1: i32) -> (i32, i32) {
    %c0_i32 = arith.constant 0 : i32
    %c0_i32_0 = arith.constant 0 : i32
    %c0_i32_1 = arith.constant 0 : i32
    return %c0_i32, %c0_i32_0 : i32, i32
  }
  func.func @transform_3(%arg0: i32, %arg1: i32) -> (i32, i32) {
    %c0_i32 = arith.constant 0 : i32
    %c0_i32_0 = arith.constant 0 : i32
    %c0_i32_1 = arith.constant 0 : i32
    return %c0_i32, %c0_i32_0 : i32, i32
  }
  func.func @transform_4(%arg0: i32, %arg1: i32) -> (i32, i32) {
    %c0_i32 = arith.constant 0 : i32
    %c0_i32_0 = arith.constant 0 : i32
    %c0_i32_1 = arith.constant 0 : i32
    return %c0_i32, %c0_i32_0 : i32, i32
  }
  func.func @transform_5(%arg0: i32, %arg1: i32) -> (i32, i32) {
    %c0_i32 = arith.constant 0 : i32
    %c0_i32_0 = arith.constant 0 : i32
    %c0_i32_1 = arith.constant 0 : i32
    return %c0_i32, %c0_i32_0 : i32, i32
  }
  func.func @transform_6(%arg0: i32, %arg1: i32) -> (i32, i32) {
    %c0_i32 = arith.constant 0 : i32
    %c0_i32_0 = arith.constant 0 : i32
    %c0_i32_1 = arith.constant 0 : i32
    return %c0_i32, %c0_i32_0 : i32, i32
  }
  func.func @transform_7(%arg0: i32, %arg1: i32) -> (i32, i32) {
    %c0_i32 = arith.constant 0 : i32
    %c0_i32_0 = arith.constant 0 : i32
    return %c0_i32, %arg1 : i32, i32
  }
  func.func @transform_8(%arg0: i32, %arg1: i32) -> (i32, i32) {
    %c0_i32 = arith.constant 0 : i32
    %c0_i32_0 = arith.constant 0 : i32
    return %c0_i32, %arg1 : i32, i32
  }
  func.func @transform_9(%arg0: i32, %arg1: i32) -> (i32, i32) {
    %c0_i32 = arith.constant 0 : i32
    %c0_i32_0 = arith.constant 0 : i32
    return %arg0, %c0_i32 : i32, i32
  }
  func.func @transform_10(%arg0: i32, %arg1: i32) -> (i32, i32) {
    %c0_i32 = arith.constant 0 : i32
    return %arg0, %arg1 : i32, i32
  }
}

</mosaic_0001>

<bundles_post_ra>
// kernel: tpu_custom_call.1
= control target key start
LH: loop header
LB: loop body
LE: loop exit
PB: predicated region body
PF: predicated region fallthrough
CT: control target
= control target key end

     0   :  { %16 = vsyncpa [#allocation4], 0  ;;  %s1731_s0 = inlined_call_operand.hbm [shape: bf16[8,512], index: 0, kind: input, shape index: {}]   ;;  %s1732_s1 = inlined_call_operand.hbm [shape: bf16[512,128], index: 1, kind: input, shape index: {}]   ;;  %s1733_s2 = inlined_call_operand.vmem [shape: f32[1,128], index: 2, kind: input, shape index: {}]   ;;  %s1734_s3 = inlined_call_operand.hbm [shape: bf16[128,128], index: 3, kind: input, shape index: {}]   ;;  %s1735_s4 = inlined_call_operand.vmem [shape: f32[1,128], index: 4, kind: input, shape index: {}]   ;;  %s1736_s5 = inlined_call_operand.hbm [shape: bf16[128,128], index: 5, kind: input, shape index: {}]   ;;  %s1737_s6 = inlined_call_operand.vmem [shape: f32[1,128], index: 6, kind: input, shape index: {}]   ;;  %s1738_s7 = inlined_call_operand.hbm [shape: bf16[128,512], index: 7, kind: input, shape index: {}]   ;;  %s1739_s8 = inlined_call_operand.vmem [shape: f32[1,512], index: 8, kind: input, shape index: {}]   ;;  %s1740_s9 = inlined_call_operand.hbm [shape: f32[8,128], index: 9, kind: output, shape index: {0}]   ;;  %s1741_s10 = inlined_call_operand.hbm [shape: f32[8,512], index: 10, kind: output, shape index: {1}]  }
   0x1   :  { %17 = vsyncpa [#allocation7], 0 }
   0x2   :  { %18 = vsyncpa [#allocation10], 0 }
   0x3   :  { %19 = vsyncpa [#allocation5], 0 }
   0x4   :  { %20 = vsyncpa [#allocation14], 0  ;;  %s1539_s13 = smov [#allocation6]   ;;  %s1375_s17 = scalar_lea.hbm %s1732_s1, 4096 }
   0x5   :  { %s36_s14 = sshll.u32 %s1539_s13, 4  ;;  %p1376_p0 = scmp.ne.s32.totalorder %s1732_s1, %s1375_s17  ;;  %s37_s14 = int_to_ptr.vmem [resolvable:$true] %s36_s14 }
   0x6   :  { %p1379_p1 = scmp.lt.u32.totalorder %s1375_s17, %s1732_s1 }
   0x8   :  { %p1381_p2 = pnand %p1379_p1, %p1376_p0 }
   0xa   :  { %1384 = shalt.err (!%p1381_p2)
}
   0xb   :  { %s1385_s22 = scalar_lea.vmem %s37_s14, 4096  ;;  %p1390_p4 = scmp.lt.s32.totalorder %s37_s14, %s37_s14 }
   0xc   :  { %p1386_p3 = scmp.ne.s32.totalorder %s37_s14, %s1385_s22  ;;  %p1391_p5 = scmp.lt.s32.totalorder %s1385_s22, %s1385_s22 }
   0xe   :  { %p1392_p6 = por %p1391_p5, %p1390_p4 }
  0x10   :  { %p1393_p7 = pnand %p1392_p6, %p1386_p3 }
  0x12   :  { %1396 = shalt.err (!%p1393_p7)
}
  0x13   :  { %s1540_s23 = smov 64   ;;  %s1541_s24 = smov 4  }
  0x14   :  { %42 = dma.hbm_to_vmem [thread:$0]  %s1732_s1, 4096, %s37_s14, [#allocation7], %s1540_s23, %s1540_s23, %s1541_s24  }
  0x15   :  { %s1542_s27 = smov [#allocation9]   ;;  %s1543_s29 = smov [#allocation3]  }
  0x16   :  { %s64_s28 = sshll.u32 %s1542_s27, 4  ;;  %s27_s30 = sshll.u32 %s1543_s29, 4  ;;  %s65_s28 = int_to_ptr.vmem [resolvable:$true] %s64_s28  ;;  %s28_s30 = int_to_ptr.vmem [resolvable:$true] %s27_s30 }
  0x17   :  { %s1397_s13 = scalar_lea.hbm %s1736_s5, 1024 }
  0x18   :  { %p1398_p8 = scmp.ne.s32.totalorder %s1736_s5, %s1397_s13  ;;  %p1401_p9 = scmp.lt.u32.totalorder %s1397_s13, %s1736_s5 }
  0x1a   :  { %p1403_p10 = pnand %p1401_p9, %p1398_p8 }
  0x1c   :  { %1406 = shalt.err (!%p1403_p10)
}
  0x1d   :  { %s1407_s1 = scalar_lea.vmem %s65_s28, 1024  ;;  %p1412_p12 = scmp.lt.s32.totalorder %s65_s28, %s65_s28 }
  0x1e   :  { %p1408_p11 = scmp.ne.s32.totalorder %s65_s28, %s1407_s1  ;;  %p1413_p13 = scmp.lt.s32.totalorder %s1407_s1, %s1407_s1 }
  0x20   :  { %p1414_p0 = por %p1413_p13, %p1412_p12 }
  0x22   :  { %p1415_p1 = pnand %p1414_p0, %p1408_p11 }
  0x24   :  { %1418 = shalt.err (!%p1415_p1)
}
  0x25   :  { %70 = dma.hbm_to_vmem [thread:$0]  %s1736_s5, 1024, %s65_s28, [#allocation10], %s1540_s23, %s1540_s23, %s1541_s24  }
  0x26   :  { %s1419_s22 = scalar_lea.hbm %s1731_s0, 256 }
  0x27   :  { %p1420_p2 = scmp.ne.s32.totalorder %s1731_s0, %s1419_s22  ;;  %p1423_p3 = scmp.lt.u32.totalorder %s1419_s22, %s1731_s0 }
  0x29   :  { %p1425_p4 = pnand %p1423_p3, %p1420_p2 }
  0x2b   :  { %1428 = shalt.err (!%p1425_p4)
}
  0x2c   :  { %s1429_s11 = scalar_lea.vmem %s28_s30, 256  ;;  %p1434_p6 = scmp.lt.s32.totalorder %s28_s30, %s28_s30 }
  0x2d   :  { %p1430_p5 = scmp.ne.s32.totalorder %s28_s30, %s1429_s11  ;;  %p1435_p7 = scmp.lt.s32.totalorder %s1429_s11, %s1429_s11 }
  0x2f   :  { %p1436_p8 = por %p1435_p7, %p1434_p6 }
  0x31   :  { %p1437_p9 = pnand %p1436_p8, %p1430_p5 }
  0x33   :  { %1440 = shalt.err (!%p1437_p9)
}
  0x34   :  { %30 = dma.hbm_to_vmem [thread:$0]  %s1731_s0, 256, %s28_s30, [#allocation4]  }
  0x35   :  { %s1544_s12 = smov [#allocation8]   ;;  %s1545_s15 = smov [#allocation11]  }
  0x36   :  { %s50_s13 = sshll.u32 %s1544_s12, 4  ;;  %s78_s16 = sshll.u32 %s1545_s15, 4  ;;  %s51_s13 = int_to_ptr.vmem [resolvable:$true] %s50_s13  ;;  %s79_s16 = int_to_ptr.vmem [resolvable:$true] %s78_s16 }
  0x37   :  { %s1441_s1 = scalar_lea.hbm %s1734_s3, 1024 }
  0x38   :  { %p1442_p10 = scmp.ne.s32.totalorder %s1734_s3, %s1441_s1  ;;  %p1445_p11 = scmp.lt.u32.totalorder %s1441_s1, %s1734_s3 }
  0x3a   :  { %p1447_p12 = pnand %p1445_p11, %p1442_p10 }
  0x3c   :  { %1450 = shalt.err (!%p1447_p12)
}
  0x3d   :  { %s1451_s0 = scalar_lea.vmem %s51_s13, 1024  ;;  %p1456_p0 = scmp.lt.s32.totalorder %s51_s13, %s51_s13 }
  0x3e   :  { %p1452_p13 = scmp.ne.s32.totalorder %s51_s13, %s1451_s0  ;;  %p1457_p1 = scmp.lt.s32.totalorder %s1451_s0, %s1451_s0 }
  0x40   :  { %p1458_p2 = por %p1457_p1, %p1456_p0 }
  0x42   :  { %p1459_p3 = pnand %p1458_p2, %p1452_p13 }
  0x44   :  { %1462 = shalt.err (!%p1459_p3)
}
  0x45   :  { %56 = dma.hbm_to_vmem [thread:$0]  %s1734_s3, 1024, %s51_s13, [#allocation7], %s1540_s23, %s1540_s23, %s1541_s24  }
  0x46   :  { %s1463_s27 = scalar_lea.hbm %s1738_s7, 4096 }
  0x47   :  { %p1464_p4 = scmp.ne.s32.totalorder %s1738_s7, %s1463_s27  ;;  %p1467_p5 = scmp.lt.u32.totalorder %s1463_s27, %s1738_s7 }
  0x49   :  { %p1469_p6 = pnand %p1467_p5, %p1464_p4 }
  0x4b   :  { %1472 = shalt.err (!%p1469_p6)
}
  0x4c   :  { %s1473_s12 = scalar_lea.vmem %s79_s16, 4096  ;;  %p1478_p8 = scmp.lt.s32.totalorder %s79_s16, %s79_s16 }
  0x4d   :  { %p1474_p7 = scmp.ne.s32.totalorder %s79_s16, %s1473_s12  ;;  %p1479_p9 = scmp.lt.s32.totalorder %s1473_s12, %s1473_s12 }
  0x4f   :  { %p1480_p10 = por %p1479_p9, %p1478_p8 }
  0x51   :  { %p1481_p11 = pnand %p1480_p10, %p1474_p7 }
  0x53   :  { %1484 = shalt.err (!%p1481_p11)
}
  0x54   :  { %s1546_s3 = smov 256   ;;  %s1547_s23 = smov 16  }
  0x55   :  { %84 = dma.hbm_to_vmem [thread:$0]  %s1738_s7, 4096, %s79_s16, [#allocation10], %s1546_s3, %s1546_s3, %s1547_s23  }
  0x56   :  { %1529 = dma.done.wait [#allocation4], 256  }
  0x57   :  { %1530 = vsyncadd [#allocation4], 4294967040 }
  0x58   :  { %1531 = dma.done.wait [#allocation7], 5120  }
  0x59   :  { %1532 = vsyncadd [#allocation7], 4294962176 }
  0x5a   :  { %1533 = dma.done.wait [#allocation10], 5120  }
  0x5b   :  { %1534 = vsyncadd [#allocation10], 4294962176  ;;  %v1259_v0 = vld [vmem:[#allocation6 + $0x40] sm:$0xff]   ;;  %v1263_v4 = vld [vmem:[#allocation6 + $0x48] sm:$0xff]   ;;  %v1548_v39 = vmov 0.0   ;;  %vm1549_vm0 = vmmov 0  }
  0x5c   :  { %v1260_v1 = vld [vmem:[#allocation6 + $0xc0] sm:$0xff]   ;;  %1143 = vmatprep.subr.bf16.mxu0 %v1259_v0  ;;  %v1264_v5 = vld [vmem:[#allocation6 + $0xc8] sm:$0xff]   ;;  %v1267_v8 = vld [vmem:[#allocation6 + $0x50] sm:$0xff]   ;;  %s1551_s18 = smov [#allocation12]  }
  0x5d   :  { %v1261_v2 = vld [vmem:[#allocation6] sm:$0xff]   ;;  %1165 = vmatprep.subr.bf16.mxu1 %v1260_v1  ;;  %v1265_v6 = vld [vmem:[#allocation6 + $0x8] sm:$0xff]   ;;  %v1268_v9 = vld [vmem:[#allocation6 + $0xd0] sm:$0xff]   ;;  %s1027_s1 = sshll.u32 %s1551_s18, 4  ;;  %s1028_s1 = int_to_ptr.vmem [resolvable:$true] %s1027_s1 }
  0x5e   :  { %v1262_v3 = vld [vmem:[#allocation6 + $0x80] sm:$0xff]   ;;  %1144 = vmatpush3.bf16.msra.mxu0 %v1261_v2  ;;  %v1266_v7 = vld [vmem:[#allocation6 + $0x88] sm:$0xff]   ;;  %v1269_v10 = vld [vmem:[#allocation6 + $0x10] sm:$0xff]   ;;  %s1485_s14 = scalar_lea.vmem %s1028_s1, 128  ;;  %p1490_p13 = scmp.lt.s32.totalorder %s1028_s1, %s1028_s1 }
  0x5f   :  { %1166 = vmatpush3.bf16.msra.mxu1 %v1262_v3  ;;  %1145 = vmatprep.subr.bf16.mxu0 %v1263_v4  ;;  %v1270_v11 = vld [vmem:[#allocation6 + $0x90] sm:$0xff]   ;;  %v1271_v12 = vld [vmem:[#allocation6 + $0x58] sm:$0xff]   ;;  %v1275_v16 = vld [vmem:[#allocation6 + $0x60] sm:$0xff]   ;;  %p1486_p12 = scmp.ne.s32.totalorder %s1028_s1, %s1485_s14  ;;  %p1491_p0 = scmp.lt.s32.totalorder %s1485_s14, %s1485_s14 }
  0x60   :  { %1167 = vmatprep.subr.bf16.mxu1 %v1264_v5  ;;  %v1272_v13 = vld [vmem:[#allocation6 + $0xd8] sm:$0xff]   ;;  %v1276_v17 = vld [vmem:[#allocation6 + $0xe0] sm:$0xff]   ;;  %v1279_v20 = vld [vmem:[#allocation6 + $0x68] sm:$0xff]  }
  0x61   :  { %v1273_v14 = vld [vmem:[#allocation6 + $0x18] sm:$0xff]   ;;  %v1277_v18 = vld [vmem:[#allocation6 + $0x20] sm:$0xff]   ;;  %v1280_v21 = vld [vmem:[#allocation6 + $0xe8] sm:$0xff]   ;;  %p1492_p1 = por %p1491_p0, %p1490_p13 }
  0x62   :  { %1146 = vmatpush3.bf16.msra.mxu0 %v1265_v6  ;;  %v1274_v15 = vld [vmem:[#allocation6 + $0x98] sm:$0xff]   ;;  %v1278_v19 = vld [vmem:[#allocation6 + $0xa0] sm:$0xff]   ;;  %v1281_v22 = vld [vmem:[#allocation6 + $0x28] sm:$0xff]  }
  0x63   :  { %1168 = vmatpush3.bf16.msra.mxu1 %v1266_v7  ;;  %1147 = vmatprep.subr.bf16.mxu0 %v1267_v8  ;;  %v1282_v23 = vld [vmem:[#allocation6 + $0xa8] sm:$0xff]   ;;  %v1283_v24 = vld [vmem:[#allocation6 + $0x70] sm:$0xff]   ;;  %v1287_v28 = vld [vmem:[#allocation6 + $0x78] sm:$0xff]   ;;  %p1493_p2 = pnand %p1492_p1, %p1486_p12 }
  0x64   :  { %1169 = vmatprep.subr.bf16.mxu1 %v1268_v9  ;;  %v1284_v25 = vld [vmem:[#allocation6 + $0xf0] sm:$0xff]   ;;  %v1288_v29 = vld [vmem:[#allocation6 + $0xf8] sm:$0xff]   ;;  %v1295_v38 = vld [vmem:[#allocation8] sm:$0xff]  }
  0x65   :  { %v1285_v26 = vld [vmem:[#allocation6 + $0x30] sm:$0xff]   ;;  %v1289_v30 = vld [vmem:[#allocation6 + $0x38] sm:$0xff]   ;;  %v1296_v40 = vld [vmem:[#allocation8 + $0x8] sm:$0xff]  }
  0x66   :  { %1148 = vmatpush3.bf16.msra.mxu0 %v1269_v10  ;;  %v1286_v27 = vld [vmem:[#allocation6 + $0xb0] sm:$0xff]   ;;  %v1290_v31 = vld [vmem:[#allocation6 + $0xb8] sm:$0xff]   ;;  %v1299_v43 = vld [vmem:[#allocation8 + $0x20] sm:$0xff]  }
  0x67   :  { %1170 = vmatpush3.bf16.msra.mxu1 %v1270_v11  ;;  %1149 = vmatprep.subr.bf16.mxu0 %v1271_v12  ;;  %v107_v32 = vld [vmem:[#allocation3] sm:$0xff]  ;;  %v108_v33 = vld [vmem:[#allocation3 + $0x8] sm:$0xff]  ;;  %v1300_v44 = vld [vmem:[#allocation8 + $0x28] sm:$0xff]  }
  0x68   :  { %1171 = vmatprep.subr.bf16.mxu1 %v1272_v13  ;;  %v1053_v34 = vcombine.low %v107_v32, %v107_v32  ;;  %v1054_v35 = vcombine.high %v107_v32, %v107_v32  ;;  %v1055_v36 = vcombine.low %v108_v33, %v108_v33  ;;  %v1056_v37 = vcombine.high %v108_v33, %v108_v33  ;;  %v1297_v41 = vld [vmem:[#allocation8 + $0x10] sm:$0xff]   ;;  %v1298_v42 = vld [vmem:[#allocation8 + $0x18] sm:$0xff]   ;;  %v1303_v47 = vld [vmem:[#allocation9] sm:$0xff]  }
  0x69   :  { %v1301_v45 = vld [vmem:[#allocation8 + $0x30] sm:$0xff]   ;;  %v1302_v46 = vld [vmem:[#allocation8 + $0x38] sm:$0xff]   ;;  %v1304_v48 = vld [vmem:[#allocation9 + $0x8] sm:$0xff]  }
  0x6a   :  { %1150 = vmatpush3.bf16.msra.mxu0 %v1273_v14  ;;  %418 = vmatprep.mubr.bf16.mxu0 %v1054_v35  ;;  %v1305_v49 = vld [vmem:[#allocation9 + $0x10] sm:$0xff]   ;;  %v1306_v50 = vld [vmem:[#allocation9 + $0x18] sm:$0xff]   ;;  %v1307_v51 = vld [vmem:[#allocation9 + $0x20] sm:$0xff]  }
  0x6b   :  { %1172 = vmatpush3.bf16.msra.mxu1 %v1274_v15  ;;  %1151 = vmatprep.subr.bf16.mxu0 %v1275_v16  ;;  %v1308_v52 = vld [vmem:[#allocation9 + $0x28] sm:$0xff]   ;;  %v1309_v4 = vld [vmem:[#allocation9 + $0x30] sm:$0xff]   ;;  %v1310_v5 = vld [vmem:[#allocation9 + $0x38] sm:$0xff]  }
  0x6c   :  { %1173 = vmatprep.subr.bf16.mxu1 %v1276_v17  ;;  %458 = vmatprep.mubr.bf16.mxu1 %v1056_v37  ;;  %v1052_v55 = vld [vmem:[%s1733_s2] ss:$0 sm:$0xff]  ;;  %v1311_v6 = vld [vmem:[#allocation11] ss:$16 sps:$4 sm:$0xff]   ;;  %v1313_v7 = vld [vmem:[#allocation11 + $0x4] ss:$16 sps:$4 sm:$0xff]  }
  0x6d   :  { %v1316_v8 = vld [vmem:[#allocation11 + $0xc] ss:$16 sps:$4 sm:$0xff]   ;;  %v1319_v9 = vld [vmem:[#allocation11 + $0x24] ss:$16 sps:$4 sm:$0xff]   ;;  %v1317_v10 = vld [vmem:[#allocation11 + $0x20] ss:$16 sps:$4 sm:$0xff]  }
  0x6e   :  { %1152 = vmatpush3.bf16.msra.mxu0 %v1277_v18  ;;  %v1325_v11 = vld [vmem:[#allocation11 + $0x44] ss:$16 sps:$4 sm:$0xff]   ;;  %v1323_v12 = vld [vmem:[#allocation11 + $0x40] ss:$16 sps:$4 sm:$0xff]   ;;  %v1089_v17 = vld [vmem:[%s1735_s4] ss:$0 sm:$0xff] }
  0x6f   :  { %1174 = vmatpush3.bf16.msra.mxu1 %v1278_v19  ;;  %1153 = vmatprep.subr.bf16.mxu0 %v1279_v20  ;;  %v1331_v13 = vld [vmem:[#allocation11 + $0x64] ss:$16 sps:$4 sm:$0xff]   ;;  %v1329_v14 = vld [vmem:[#allocation11 + $0x60] ss:$16 sps:$4 sm:$0xff]   ;;  %v1340_v32 = vld [vmem:[#allocation11 + $0x8c] ss:$16 sps:$4 sm:$0xff]  }
  0x70   :  { %1175 = vmatprep.subr.bf16.mxu1 %v1280_v21  ;;  %v1337_v15 = vld [vmem:[#allocation11 + $0x84] ss:$16 sps:$4 sm:$0xff]   ;;  %v1335_v16 = vld [vmem:[#allocation11 + $0x80] ss:$16 sps:$4 sm:$0xff]   ;;  %v1338_v33 = vld [vmem:[#allocation11 + $0x88] ss:$16 sps:$4 sm:$0xff]  }
  0x71   :  { %v1346_v35 = vld [vmem:[#allocation11 + $0xac] ss:$16 sps:$4 sm:$0xff]   ;;  %v1344_v37 = vld [vmem:[#allocation11 + $0xa8] ss:$16 sps:$4 sm:$0xff]  }
  0x72   :  { %1154 = vmatpush3.bf16.msra.mxu0 %v1281_v22 }
  0x73   :  { %1176 = vmatpush3.bf16.msra.mxu1 %v1282_v23  ;;  %1155 = vmatprep.subr.bf16.mxu0 %v1283_v24  ;;  %v1314_v24 = vld [vmem:[#allocation11 + $0x8] ss:$16 sps:$4 sm:$0xff]  }
  0x74   :  { %1177 = vmatprep.subr.bf16.mxu1 %v1284_v25 }
  0x76   :  { %1156 = vmatpush3.bf16.msra.mxu0 %v1285_v26  ;;  %v1322_v26 = vld [vmem:[#allocation11 + $0x2c] ss:$16 sps:$4 sm:$0xff]  }
  0x77   :  { %1178 = vmatpush3.bf16.msra.mxu1 %v1286_v27  ;;  %1157 = vmatprep.subr.bf16.mxu0 %v1287_v28  ;;  %v1320_v27 = vld [vmem:[#allocation11 + $0x28] ss:$16 sps:$4 sm:$0xff]   ;;  %v1328_v28 = vld [vmem:[#allocation11 + $0x4c] ss:$16 sps:$4 sm:$0xff]  }
  0x78   :  { %1179 = vmatprep.subr.bf16.mxu1 %v1288_v29  ;;  %v1326_v29 = vld [vmem:[#allocation11 + $0x48] ss:$16 sps:$4 sm:$0xff]  }
  0x7a   :  { %1158 = vmatpush3.bf16.msra.mxu0 %v1289_v30  ;;  %v1334_v30 = vld [vmem:[#allocation11 + $0x6c] ss:$16 sps:$4 sm:$0xff]  }
  0x7b   :  { %1180 = vmatpush3.bf16.msra.mxu1 %v1290_v31  ;;  %1205 = vmatprep.subr.bf16.mxu0 %v1548_v39  ;;  %v1332_v31 = vld [vmem:[#allocation11 + $0x68] ss:$16 sps:$4 sm:$0xff]  }
  0x7c   :  { %1225 = vmatprep.subr.bf16.mxu1 %v1548_v39 }
  0x7d   :  { %419 = vmatmul.mubr.bf16.vlgmr.msra.gmra.mrb[0].mxu0 %v1053_v34  ;;  %v1343_v34 = vld [vmem:[#allocation11 + $0xa4] ss:$16 sps:$4 sm:$0xff]  }
  0x7e   :  { %459 = vmatmul.mubr.bf16.vlgmr.msra.gmra.mrb[0].mxu1 %v1055_v36  ;;  %1206 = vmatpush3.bf16.msra.mxu0 %v1295_v38  ;;  %v1341_v36 = vld [vmem:[#allocation11 + $0xa0] ss:$16 sps:$4 sm:$0xff]   ;;  %v1349_v38 = vld [vmem:[#allocation11 + $0xc4] ss:$16 sps:$4 sm:$0xff]  }
  0x7f   :  { %1207 = vmatprep.subr.bf16.mxu0 %v1548_v39  ;;  %1221 = vmatprep.mubr.msk.bf16.mxu0 %vm1549_vm0, %v1548_v39 }
  0x80   :  { %1241 = vmatprep.mubr.msk.bf16.mxu1 %vm1549_vm0, %v1548_v39  ;;  %1226 = vmatpush3.bf16.msra.mxu1 %v1303_v47  ;;  %v1098_v47 = vld [vmem:[%s1737_s6] ss:$0 sm:$0xff] }
  0x81   :  { %1227 = vmatprep.subr.bf16.mxu1 %v1548_v39 }
  0x82   :  { %1208 = vmatpush3.bf16.msra.mxu0 %v1296_v40  ;;  %v1347_v40 = vld [vmem:[#allocation11 + $0xc0] ss:$16 sps:$4 sm:$0xff]  }
  0x83   :  { %1209 = vmatprep.subr.bf16.mxu0 %v1548_v39 }
  0x84   :  { %1228 = vmatpush3.bf16.msra.mxu1 %v1304_v48 }
  0x85   :  { %1229 = vmatprep.subr.bf16.mxu1 %v1548_v39 }
  0x86   :  { %1210 = vmatpush3.bf16.msra.mxu0 %v1297_v41  ;;  %v1350_v41 = vld [vmem:[#allocation11 + $0xc8] ss:$16 sps:$4 sm:$0xff]  }
  0x87   :  { %1211 = vmatprep.subr.bf16.mxu0 %v1548_v39 }
  0x88   :  { %1230 = vmatpush3.bf16.msra.mxu1 %v1305_v49 }
  0x89   :  { %1231 = vmatprep.subr.bf16.mxu1 %v1548_v39 }
  0x8a   :  { %1212 = vmatpush3.bf16.msra.mxu0 %v1298_v42  ;;  %v1353_v42 = vld [vmem:[#allocation11 + $0xe0] ss:$16 sps:$4 sm:$0xff]  }
  0x8b   :  { %1213 = vmatprep.subr.bf16.mxu0 %v1548_v39 }
  0x8c   :  { %1232 = vmatpush3.bf16.msra.mxu1 %v1306_v50 }
  0x8d   :  { %1233 = vmatprep.subr.bf16.mxu1 %v1548_v39 }
  0x8e   :  { %1214 = vmatpush3.bf16.msra.mxu0 %v1299_v43  ;;  %v1355_v43 = vld [vmem:[#allocation11 + $0xe4] ss:$16 sps:$4 sm:$0xff]  }
  0x8f   :  { %1215 = vmatprep.subr.bf16.mxu0 %v1548_v39 }
  0x90   :  { %1234 = vmatpush3.bf16.msra.mxu1 %v1307_v51 }
  0x91   :  { %1235 = vmatprep.subr.bf16.mxu1 %v1548_v39 }
  0x92   :  { %1216 = vmatpush3.bf16.msra.mxu0 %v1300_v44  ;;  %v1356_v44 = vld [vmem:[#allocation11 + $0xe8] ss:$16 sps:$4 sm:$0xff]  }
  0x93   :  { %1217 = vmatprep.subr.bf16.mxu0 %v1548_v39 }
  0x94   :  { %1236 = vmatpush3.bf16.msra.mxu1 %v1308_v52 }
  0x95   :  { %1237 = vmatprep.subr.bf16.mxu1 %v1548_v39 }
  0x96   :  { %1218 = vmatpush3.bf16.msra.mxu0 %v1301_v45  ;;  %v1358_v45 = vld [vmem:[#allocation11 + $0xec] ss:$16 sps:$4 sm:$0xff]  }
  0x97   :  { %1219 = vmatprep.subr.bf16.mxu0 %v1548_v39 }
  0x98   :  { %1238 = vmatpush3.bf16.msra.mxu1 %v1309_v4 }
  0x99   :  { %1239 = vmatprep.subr.bf16.mxu1 %v1548_v39  ;;  %v1352_v39 = vld [vmem:[#allocation11 + $0xcc] ss:$16 sps:$4 sm:$0xff]  }
  0x9a   :  { %1220 = vmatpush3.bf16.msra.mxu0 %v1302_v46  ;;  %v1550_v46 = vmov 0  }
  0x9b   :  { %911 = vmatprep.subr.bf16.mxu0 %v1313_v7 }
  0x9c   :  { %1240 = vmatpush3.bf16.msra.mxu1 %v1310_v5 }
  0x9d   :  { %952 = vmatprep.subr.bf16.mxu1 %v1316_v8 }
 0x150   :  { %v1159_v53 = vpop.f32.mrb[0].mxu0 }
 0x151   :  { %v1181_v54 = vpop.f32.mrb[0].mxu1  ;;  %v1160_v56 = vpop.f32.mrb[1].mxu0 }
 0x152   :  { %v1182_v57 = vpop.f32.mrb[1].mxu1  ;;  %v1161_v58 = vadd.f32 %v1160_v56, %v1159_v53  ;;  %v1162_v60 = vpop.f32.mrb[2].mxu0 }
 0x153   :  { %v1183_v59 = vadd.f32 %v1182_v57, %v1181_v54  ;;  %v1184_v61 = vpop.f32.mrb[2].mxu1  ;;  %v1163_v62 = vpop.f32.mrb[3].mxu0 }
 0x154   :  { %v1185_v63 = vpop.f32.mrb[3].mxu1  ;;  %v421_v0 = vadd.f32 %v1161_v58, %v1052_v55 }
 0x156   :  { %v461_v1 = vadd.f32 %v1183_v59, %v421_v0 }
 0x158   :  { %v466_v2 = vmax.f32 %v461_v1, 0.0 }
 0x15a   :  { %v467_v3 = vpack.c.bf16 %v466_v2, %v466_v2 }
 0x15c   :  { %1222 = vmatmul.mubr.bf16.vlgmr.msra.gmra.mrb[4].mxu0 %v467_v3 }
 0x15d   :  { %912 = vmatpush1.bf16.msra.mxu0 %v1311_v6  ;;  %943 = vmatprep.mubr.bf16.mxu0 %v1550_v46 }
 0x15e   :  { %913 = vmatprep.subr.bf16.mxu0 %v1319_v9 }
 0x161   :  { %914 = vmatpush1.bf16.msra.mxu0 %v1317_v10 }
 0x162   :  { %915 = vmatprep.subr.bf16.mxu0 %v1325_v11 }
 0x165   :  { %916 = vmatpush1.bf16.msra.mxu0 %v1323_v12 }
 0x166   :  { %917 = vmatprep.subr.bf16.mxu0 %v1331_v13 }
 0x169   :  { %918 = vmatpush1.bf16.msra.mxu0 %v1329_v14 }
 0x16a   :  { %919 = vmatprep.subr.bf16.mxu0 %v1337_v15 }
 0x16d   :  { %920 = vmatpush1.bf16.msra.mxu0 %v1335_v16 }
 0x16e   :  { %921 = vmatprep.subr.bf16.mxu0 %v1343_v34 }
 0x171   :  { %922 = vmatpush1.bf16.msra.mxu0 %v1341_v36 }
 0x172   :  { %923 = vmatprep.subr.bf16.mxu0 %v1349_v38 }
 0x175   :  { %924 = vmatpush1.bf16.msra.mxu0 %v1347_v40 }
 0x176   :  { %925 = vmatprep.subr.bf16.mxu0 %v1355_v43 }
 0x179   :  { %926 = vmatpush1.bf16.msra.mxu0 %v1353_v42 }
 0x22f   :  { %v573_v18 = vpop.f32.mrb[4].mxu0 }
 0x230   :  { %v574_v19 = vadd.f32 %v1089_v17, %v573_v18  ;;  %v1223_v20 = vpop.f32.mrb[5].mxu0 }
 0x231   :  { %v576_v21 = vpop.f32.mrb[6].mxu0 }
 0x232   :  { %v579_v22 = vmax.f32 %v574_v19, 0.0  ;;  %v1224_v23 = vpop.f32.mrb[7].mxu0 }
 0x234   :  { %v581_v25 = vpack.c.bf16 %v579_v22, %v579_v22  ;;  %580 = vst [vmem:[#allocation12] sm:$0xff] %v579_v22 }
 0x236   :  { %1242 = vmatmul.mubr.bf16.vlgmr.msra.gmra.mrb[4].mxu1 %v581_v25 }
 0x237   :  { %953 = vmatpush1.bf16.msra.mxu1 %v1314_v24  ;;  %984 = vmatprep.mubr.bf16.mxu1 %v1550_v46 }
 0x238   :  { %954 = vmatprep.subr.bf16.mxu1 %v1322_v26 }
 0x23b   :  { %955 = vmatpush1.bf16.msra.mxu1 %v1320_v27 }
 0x23c   :  { %956 = vmatprep.subr.bf16.mxu1 %v1328_v28 }
 0x23f   :  { %957 = vmatpush1.bf16.msra.mxu1 %v1326_v29 }
 0x240   :  { %958 = vmatprep.subr.bf16.mxu1 %v1334_v30 }
 0x243   :  { %959 = vmatpush1.bf16.msra.mxu1 %v1332_v31 }
 0x244   :  { %960 = vmatprep.subr.bf16.mxu1 %v1340_v32 }
 0x247   :  { %961 = vmatpush1.bf16.msra.mxu1 %v1338_v33 }
 0x248   :  { %962 = vmatprep.subr.bf16.mxu1 %v1346_v35 }
 0x24b   :  { %963 = vmatpush1.bf16.msra.mxu1 %v1344_v37 }
 0x24c   :  { %964 = vmatprep.subr.bf16.mxu1 %v1352_v39 }
 0x24f   :  { %965 = vmatpush1.bf16.msra.mxu1 %v1350_v41 }
 0x250   :  { %966 = vmatprep.subr.bf16.mxu1 %v1358_v45 }
 0x253   :  { %967 = vmatpush1.bf16.msra.mxu1 %v1356_v44 }
 0x309   :  { %v687_v48 = vpop.f32.mrb[4].mxu1 }
 0x30a   :  { %v688_v49 = vadd.f32 %v1098_v47, %v687_v48  ;;  %v1243_v50 = vpop.f32.mrb[5].mxu1 }
 0x30b   :  { %v690_v51 = vpop.f32.mrb[6].mxu1 }
 0x30c   :  { %v693_v52 = vmax.f32 %v688_v49, 0.0  ;;  %v1244_v53 = vpop.f32.mrb[7].mxu1 }
 0x30e   :  { %v694_v54 = vpack.c.bf16 %v693_v52, %v693_v52 }
 0x310   :  { %695 = vst [vmem:[#allocation2] sm:$0xf] %v694_v54 }
 0x317   :  { %v696_v55 = vld [vmem:[#allocation2] sm:$0xf] }
 0x318   :  { %944 = vmatmul.mubr.bf16.vlgmr.msra.gmra.mrb[8].mxu0 %v696_v55  ;;  %985 = vmatmul.mubr.bf16.vlgmr.msra.gmra.mrb[8].mxu1 %v696_v55 }
 0x319   :  { %1496 = shalt.err (!%p1493_p2)
}
 0x31a   :  { %s1497_s20 = scalar_lea.hbm %s1740_s9, 128 }
 0x31b   :  { %p1498_p3 = scmp.ne.s32.totalorder %s1740_s9, %s1497_s20  ;;  %p1501_p4 = scmp.lt.u32.totalorder %s1497_s20, %s1740_s9 }
 0x31d   :  { %p1503_p5 = pnand %p1501_p4, %p1498_p3 }
 0x31f   :  { %1506 = shalt.err (!%p1503_p5)
}
 0x320   :  { %1030 = dma.vmem_to_hbm [thread:$0]  %s1028_s1, 128, %s1740_s9, [#allocation5]   ;;  %v731_v56 = vlaneseq  ;;  %v729_v60 = vld [vmem:[%s1739_s8] sm:$0xf] }
 0x321   :  { %s1552_s8 = smov [#allocation13]  }
 0x322   :  { %v732_v57 = vshrl.u32 %v731_v56, 7  ;;  %s1037_s9 = sshll.u32 %s1552_s8, 4  ;;  %s1038_s9 = int_to_ptr.vmem [resolvable:$true] %s1037_s9 }
 0x323   :  { %s1507_s11 = scalar_lea.vmem %s1038_s9, 512  ;;  %p1512_p7 = scmp.lt.s32.totalorder %s1038_s9, %s1038_s9 }
 0x324   :  { %v733_v58 = vsub.s32 0, %v732_v57  ;;  %v741_v59 = vsub.s32 2, %v732_v57  ;;  %v737_v61 = vsub.s32 1, %v732_v57  ;;  %v745_v62 = vsub.s32 3, %v732_v57  ;;  %p1508_p6 = scmp.ne.s32.totalorder %s1038_s9, %s1507_s11  ;;  %p1513_p8 = scmp.lt.s32.totalorder %s1507_s11, %s1507_s11 }
 0x326   :  { %v734_v63 = vrot.slane %v729_v60, %v733_v58  ;;  %v742_v0 = vrot.slane %v729_v60, %v741_v59  ;;  %v738_v1 = vrot.slane %v729_v60, %v737_v61  ;;  %v746_v2 = vrot.slane %v729_v60, %v745_v62  ;;  %p1514_p9 = por %p1513_p8, %p1512_p7 }
 0x328   :  { %p1515_p10 = pnand %p1514_p9, %p1508_p6 }
 0x3eb   :  { %v945_v3 = vpop.f32.mrb[8].mxu0  ;;  %v986_v4 = vpop.f32.mrb[8].mxu1 }
 0x3ec   :  { %v946_v5 = vadd.f32 %v945_v3, %v734_v63  ;;  %v987_v6 = vadd.f32 %v986_v4, %v742_v0  ;;  %v947_v7 = vpop.f32.mrb[9].mxu0  ;;  %v988_v8 = vpop.f32.mrb[9].mxu1 }
 0x3ed   :  { %v948_v9 = vadd.f32 %v947_v7, %v738_v1  ;;  %v989_v10 = vadd.f32 %v988_v8, %v746_v2  ;;  %v949_v11 = vpop.f32.mrb[10].mxu0  ;;  %v990_v12 = vpop.f32.mrb[10].mxu1 }
 0x3ee   :  { %v1139_v13 = vmul.f32 -1.442695, %v946_v5  ;;  %v1141_v14 = vmul.f32 -1.442695, %v987_v6  ;;  %v950_v15 = vpop.f32.mrb[11].mxu0  ;;  %v991_v16 = vpop.f32.mrb[11].mxu1 }
 0x3ef   :  { %v1140_v17 = vmul.f32 -1.442695, %v948_v9  ;;  %v1142_v18 = vmul.f32 -1.442695, %v989_v10 }
 0x3f0   :  { %1359 = vpow2.f32 %v1139_v13 }
 0x3f1   :  { %1361 = vpow2.f32 %v1141_v14 }
 0x3f2   :  { %1363 = vpow2.f32 %v1140_v17 }
 0x3f3   :  { %1365 = vpow2.f32 %v1142_v18 }
 0x3fa   :  { %v1360_v19 = vpop.eup %1359 }
 0x3fb   :  { %v1362_v20 = vpop.eup %1361  ;;  %v1005_v21 = vadd.f32 1.0, %v1360_v19 }
 0x3fc   :  { %v1364_v22 = vpop.eup %1363  ;;  %v1007_v23 = vadd.f32 1.0, %v1362_v20 }
 0x3fd   :  { %v1366_v24 = vpop.eup %1365  ;;  %1367 = vrcp.f32 %v1005_v21  ;;  %v1006_v25 = vadd.f32 1.0, %v1364_v22 }
 0x3fe   :  { %1369 = vrcp.f32 %v1007_v23  ;;  %v1008_v26 = vadd.f32 1.0, %v1366_v24 }
 0x3ff   :  { %1371 = vrcp.f32 %v1006_v25 }
 0x400   :  { %1373 = vrcp.f32 %v1008_v26 }
 0x407   :  { %v1368_v27 = vpop.eup %1367 }
 0x408   :  { %v1370_v28 = vpop.eup %1369  ;;  %1017 = vst [vmem:[#allocation13] sm:$0xff] %v1368_v27 }
 0x409   :  { %v1372_v29 = vpop.eup %1371  ;;  %1019 = vst [vmem:[#allocation13 + $0x10] sm:$0xff] %v1370_v28 }
 0x40a   :  { %v1374_v30 = vpop.eup %1373  ;;  %1018 = vst [vmem:[#allocation13 + $0x8] sm:$0xff] %v1372_v29 }
 0x40b   :  { %1020 = vst [vmem:[#allocation13 + $0x18] sm:$0xff] %v1374_v30 }
 0x40c   :  { %1518 = shalt.err (!%p1515_p10)
}
 0x40d   :  { %s1519_s12 = scalar_lea.hbm %s1741_s10, 512 }
 0x40e   :  { %p1520_p11 = scmp.ne.s32.totalorder %s1741_s10, %s1519_s12  ;;  %p1523_p12 = scmp.lt.u32.totalorder %s1519_s12, %s1741_s10 }
 0x410   :  { %p1525_p13 = pnand %p1523_p12, %p1520_p11 }
 0x412   :  { %1528 = shalt.err (!%p1525_p13)
}
 0x413   :  { %1040 = dma.vmem_to_hbm [thread:$0]  %s1038_s9, 512, %s1741_s10, [#allocation14]  }
 0x414   :  { %1535 = dma.done.wait [#allocation5], 128  }
 0x415   :  { %1536 = vsyncadd [#allocation5], 4294967168 }
 0x416   :  { %1537 = dma.done.wait [#allocation14], 512  }
 0x417   :  { %1538 = vsyncadd [#allocation14], 4294966784 }
 0x418   :  { %1047 = vsyncpa [#allocation4], 1 }
 0x419   :  { %1048 = vsyncpa [#allocation7], 1 }
 0x41a   :  { %1049 = vsyncpa [#allocation10], 1 }
 0x41b   :  { %1050 = vsyncpa [#allocation5], 1 }
 0x41c   :  { %1051 = vsyncpa [#allocation14], 1 }

</bundles_post_ra>
